<compile_context>
chip_gen: v6e
topology: v6e:2x2x1
jax: 0.10.0
libtpu: 0.0.40
codegen_flags: <defaults>
</compile_context>

<pallas_src>
import jax
import jax.numpy as jnp
from jax.experimental import pallas as pl
from jax.experimental.pallas import tpu as pltpu

_TARGET_X_TILE_BYTES = 2 * 1024 * 1024   # ~1-4 MiB already hits ~85% of HBM roofline
_MIN_GRID_STEPS = 8                      # >= 4 tiles per TensorCore on v7x megacore


def _adain_kernel(x_ref, zwb_ref, o_ref):
    """Instance-norm stats + affine re-normalization for a block of (n, c) rows."""
    x = x_ref[...].astype(jnp.float32)                # (BR, HW), f32 compute
    hw = x.shape[1]
    inv_hw = 1.0 / hw
    inv_nm1 = 1.0 / max(hw - 1, 1)                    # unbiased var; guard HW == 1

    # Two-pass statistics: mean, then centered sum of squares. The tile is
    # VMEM-resident, so the extra lane reduction costs no HBM traffic and is
    # numerically robust (no catastrophic cancellation when |mean| >> std).
    m = jnp.sum(x, axis=1, keepdims=True) * inv_hw    # (BR, 1)
    xc = x - m
    var = jnp.sum(xc * xc, axis=1, keepdims=True) * inv_nm1
    s = jnp.sqrt(var + 1e-8)

    # 1 / (s + 1e-5) on the EUP, plus one Newton step to recover full f32 accuracy.
    d = s + 1e-5
    r = pl.reciprocal(d, approx=True)
    r = r * (2.0 - d * r)

    zwb = zwb_ref[...]                                # (BR, 2) f32: [:,0]=weight, [:,1]=bias
    w = zwb[:, 0:1] * r                               # (BR, 1)
    b = zwb[:, 1:2] - m * w                           # (BR, 1)
    o_ref[...] = (x * w + b).astype(o_ref.dtype)


def _pick_block_rows(nc, hw, itemsize):
    """Row-block size: small enough to pipeline / spread across TCs, VMEM-friendly."""
    gran = 16 if itemsize < 4 else 8                  # bf16 packs 16 rows per sublane pair
    row_bytes = max(hw * itemsize, 1)
    cap_vmem = max(gran, (_TARGET_X_TILE_BYTES // row_bytes) // gran * gran)
    nc_g = -(-nc // gran) * gran
    if nc_g >= _MIN_GRID_STEPS * gran:
        # Keep >= _MIN_GRID_STEPS grid steps before letting the tile grow.
        cap_steps = max(gran, (nc_g // _MIN_GRID_STEPS) // gran * gran)
    else:
        cap_steps = gran                              # small problem: maximize step count
    return max(gran, min(cap_vmem, cap_steps, nc_g))


def adain2d_forward(x, z, params):
    """x: (N, C, H, W), z: (N, cond_channels) -> (N, C, H, W), dtype preserved."""
    N, C, H, W = x.shape
    out_dtype = x.dtype

    # Conditioning (the two nn.Linear layers): tiny (K = cond_channels), keep in XLA.
    zw = (z @ params["make_weight_w"].T + params["make_weight_b"] + 1.0).astype(jnp.float32)
    zb = (z @ params["make_bias_w"].T + params["make_bias_b"]).astype(jnp.float32)

    NC, HW = N * C, H * W
    x2 = x.reshape(NC, HW)                                        # layout-preserving (free)
    zwb = jnp.stack([zw.reshape(NC), zb.reshape(NC)], axis=-1)    # (NC, 2) f32

    itemsize = jnp.dtype(x.dtype).itemsize
    BR = _pick_block_rows(NC, HW, itemsize)
    grid = (pl.cdiv(NC, BR),)   # ragged last block: Pallas masks its out-of-bounds writes

    # TODO(synk): for H*W that is not a multiple of 128 (e.g. 14x14, 7x7) add a
    # lane-aligned spatial (column) tile with two-pass stats to avoid masked
    # vst.msk stores; common sizes (16x16, 32x32, 64x64) are already lane-dense.

    # Generation-aware scoped-VMEM limit (v7x: 64 MiB physical; v5e default 16 MiB).
    try:
        vmem_cap = int(pltpu.get_tpu_info().vmem_capacity_bytes)
    except Exception:
        vmem_cap = 128 * 1024 * 1024
    vmem_limit = int(min(48 * 1024 * 1024, max(32 * 1024 * 1024, vmem_cap // 2)))

    cost = pl.CostEstimate(
        flops=8 * NC * HW,
        transcendentals=2 * NC,
        bytes_accessed=2 * NC * HW * itemsize + zwb.size * 4,
    )

    out = pl.pallas_call(
        _adain_kernel,
        out_shape=jax.ShapeDtypeStruct((NC, HW), out_dtype),
        grid_spec=pltpu.PrefetchScalarGridSpec(
            num_scalar_prefetch=0,
            grid=grid,
            in_specs=[pl.BlockSpec((BR, HW), lambda i: (i, 0)),
                      pl.BlockSpec((BR, 2), lambda i: (i, 0))],
            out_specs=pl.BlockSpec((BR, HW), lambda i: (i, 0)),
        ),
        compiler_params=pltpu.CompilerParams(
            dimension_semantics=("parallel",),
            vmem_limit_bytes=vmem_limit,
        ),
        cost_estimate=cost,
    )(x2, zwb)

    return out.reshape(N, C, H, W)


if __name__ == "__main__":
    key = jax.random.PRNGKey(0)
    N, C, H, W = 2, 4, 16, 16
    cond_channels = 8

    k1, k2, k3, k4, k5, k6 = jax.random.split(key, 6)
    x = jax.random.normal(k1, (N, C, H, W), dtype=jnp.float32)
    z = jax.random.normal(k2, (N, cond_channels), dtype=jnp.float32)

    # Deterministic nn.Linear-style init: U(-1/sqrt(fan_in), 1/sqrt(fan_in))
    bound = 1.0 / float(jnp.sqrt(jnp.float32(cond_channels)))
    params = {
        "make_weight_w": jax.random.uniform(k3, (C, cond_channels), jnp.float32, -bound, bound),
        "make_weight_b": jax.random.uniform(k4, (C,), jnp.float32, -bound, bound),
        "make_bias_w":   jax.random.uniform(k5, (C, cond_channels), jnp.float32, -bound, bound),
        "make_bias_b":   jax.random.uniform(k6, (C,), jnp.float32, -bound, bound),
    }

    out = adain2d_forward(x, z, params)
    jax.block_until_ready(out)

    # Pure-JAX reference (unbiased variance, matching torch.Tensor.var()'s default).
    zw_ref = z @ params["make_weight_w"].T + params["make_weight_b"] + 1.0
    zb_ref = z @ params["make_bias_w"].T + params["make_bias_b"]
    m = x.mean(axis=(2, 3), keepdims=True)
    v = x.var(axis=(2, 3), keepdims=True, ddof=1)
    s = jnp.sqrt(v + 1e-8)
    wgt = zw_ref[:, :, None, None] / (s + 1e-5)
    ref = wgt * x + (-m * wgt + zb_ref[:, :, None, None])
    assert jnp.allclose(out, ref, atol=1e-4, rtol=1e-4), "mismatch vs reference"

    print("KERNEL_OK")
</pallas_src>

<mosaic_0001>
module attributes {stable_mosaic.version = 11 : i64} {
  func.func @_adain_kernel(%arg0: i32, %arg1: memref<8x256xf32, #tpu.memory_space<vmem>>, %arg2: memref<8x2xf32, #tpu.memory_space<vmem>>, %arg3: memref<8x256xf32, #tpu.memory_space<vmem>>) attributes {dimension_semantics = [#tpu.dimension_semantics<parallel>], iteration_bounds = array<i64: 1>, scalar_prefetch = 0 : i64, scratch_operands = 0 : i64, tpu.core_type = #tpu.core_type<tc>, window_params = [{transform_indices = @transform_0, window_bounds = array<i64: 8, 256>}, {transform_indices = @transform_1, window_bounds = array<i64: 8, 2>}, {transform_indices = @transform_2, window_bounds = array<i64: 8, 256>}]} {
    %c0 = arith.constant 0 : index
    %c0_0 = arith.constant 0 : index
    %0 = vector.load %arg1[%c0, %c0_0] : memref<8x256xf32, #tpu.memory_space<vmem>>, vector<8x256xf32>
    %cst = arith.constant dense<0.000000e+00> : vector<8xf32>
    %1 = vector.multi_reduction <add>, %0, %cst [1] : vector<8x256xf32> to vector<8xf32>
    %2 = vector.shape_cast %1 : vector<8xf32> to vector<8x1xf32>
    %cst_1 = arith.constant 3.906250e-03 : f32
    %3 = vector.broadcast %cst_1 : f32 to vector<8x1xf32>
    %4 = arith.mulf %2, %3 : vector<8x1xf32>
    %5 = vector.broadcast %4 : vector<8x1xf32> to vector<8x256xf32>
    %6 = arith.subf %0, %5 : vector<8x256xf32>
    %7 = arith.mulf %6, %6 : vector<8x256xf32>
    %cst_2 = arith.constant dense<0.000000e+00> : vector<8xf32>
    %8 = vector.multi_reduction <add>, %7, %cst_2 [1] : vector<8x256xf32> to vector<8xf32>
    %9 = vector.shape_cast %8 : vector<8xf32> to vector<8x1xf32>
    %cst_3 = arith.constant 0.00392156886 : f32
    %10 = vector.broadcast %cst_3 : f32 to vector<8x1xf32>
    %11 = arith.mulf %9, %10 : vector<8x1xf32>
    %cst_4 = arith.constant 9.99999993E-9 : f32
    %12 = vector.broadcast %cst_4 : f32 to vector<8x1xf32>
    %13 = arith.addf %11, %12 : vector<8x1xf32>
    %14 = math.sqrt %13 : vector<8x1xf32>
    %cst_5 = arith.constant 9.99999974E-6 : f32
    %15 = vector.broadcast %cst_5 : f32 to vector<8x1xf32>
    %16 = arith.addf %14, %15 : vector<8x1xf32>
    %17 = tpu.reciprocal %16 {approx = true} : vector<8x1xf32> -> vector<8x1xf32>
    %18 = arith.mulf %16, %17 : vector<8x1xf32>
    %cst_6 = arith.constant 2.000000e+00 : f32
    %19 = vector.broadcast %cst_6 : f32 to vector<8x1xf32>
    %20 = arith.subf %19, %18 : vector<8x1xf32>
    %21 = arith.mulf %17, %20 : vector<8x1xf32>
    %c0_7 = arith.constant 0 : index
    %c0_8 = arith.constant 0 : index
    %22 = vector.load %arg2[%c0_7, %c0_8] : memref<8x2xf32, #tpu.memory_space<vmem>>, vector<8x2xf32>
    %23 = vector.extract_strided_slice %22 {offsets = [0, 0], sizes = [8, 1], strides = [1, 1]} : vector<8x2xf32> to vector<8x1xf32>
    %24 = arith.mulf %23, %21 : vector<8x1xf32>
    %25 = vector.extract_strided_slice %22 {offsets = [0, 1], sizes = [8, 1], strides = [1, 1]} : vector<8x2xf32> to vector<8x1xf32>
    %26 = arith.mulf %4, %24 : vector<8x1xf32>
    %27 = arith.subf %25, %26 : vector<8x1xf32>
    %28 = vector.broadcast %24 : vector<8x1xf32> to vector<8x256xf32>
    %29 = arith.mulf %0, %28 : vector<8x256xf32>
    %30 = vector.broadcast %27 : vector<8x1xf32> to vector<8x256xf32>
    %31 = arith.addf %29, %30 : vector<8x256xf32>
    %c0_9 = arith.constant 0 : index
    %c0_10 = arith.constant 0 : index
    %32 = vector.load %arg3[%c0_9, %c0_10] : memref<8x256xf32, #tpu.memory_space<vmem>>, vector<8x256xf32>
    tpu.vector_store %arg3[%c0_9, %c0_10], %31 {strides = array<i32>} : memref<8x256xf32, #tpu.memory_space<vmem>>, vector<8x256xf32>,
    return
  }
  func.func @transform_0(%arg0: i32) -> (i32, i32) {
    %c0_i32 = arith.constant 0 : i32
    %c0_i32_0 = arith.constant 0 : i32
    return %arg0, %c0_i32 : i32, i32
  }
  func.func @transform_1(%arg0: i32) -> (i32, i32) {
    %c0_i32 = arith.constant 0 : i32
    %c0_i32_0 = arith.constant 0 : i32
    return %arg0, %c0_i32 : i32, i32
  }
  func.func @transform_2(%arg0: i32) -> (i32, i32) {
    %c0_i32 = arith.constant 0 : i32
    %c0_i32_0 = arith.constant 0 : i32
    return %arg0, %c0_i32 : i32, i32
  }
}

</mosaic_0001>

<bundles_post_ra>
// kernel: tpu_custom_call.1
= control target key start
LH: loop header
LB: loop body
LE: loop exit
PB: predicated region body
PF: predicated region fallthrough
CT: control target
= control target key end

     0   :  { %7 = vsyncpa [#allocation3], 0  ;;  %s174_s0 = inlined_call_operand.hbm [shape: f32[8,256], index: 0, kind: input, shape index: {}]   ;;  %s175_s1 = inlined_call_operand.vmem [shape: f32[8,2], index: 1, kind: input, shape index: {}]   ;;  %s176_s2 = inlined_call_operand.hbm [shape: f32[8,256], index: 2, kind: output, shape index: {}]  }
   0x1   :  { %8 = vsyncpa [#allocation4], 0  ;;  %s145_s9 = smov [#allocation2]  }
   0x2   :  { %s15_s10 = sshll.u32 %s145_s9, 4  ;;  %s16_s10 = int_to_ptr.vmem [resolvable:$true] %s15_s10 }
   0x3   :  { %s109_s11 = scalar_lea.vmem %s16_s10, 256  ;;  %p114_p1 = scmp.lt.s32.totalorder %s16_s10, %s16_s10 }
   0x4   :  { %p110_p0 = scmp.ne.s32.totalorder %s16_s10, %s109_s11  ;;  %p115_p2 = scmp.lt.s32.totalorder %s109_s11, %s109_s11 }
   0x6   :  { %p116_p3 = por %p115_p2, %p114_p1 }
   0x8   :  { %p117_p4 = pnand %p116_p3, %p110_p0 }
   0xa   :  { %120 = shalt.err (!%p117_p4)
}
   0xb   :  { %18 = dma.hbm_to_vmem [thread:$0]  %s174_s0, 256, %s16_s10, [#allocation3]  }
   0xc   :  { %141 = dma.done.wait [#allocation3], 256  }
   0xd   :  { %142 = vsyncadd [#allocation3], 4294967040  ;;  %v24_v0 = vld [vmem:[#allocation2] sm:$0xff]  ;;  %v25_v1 = vld [vmem:[#allocation2 + $0x8] sm:$0xff]  ;;  %v146_v10 = vmov 0   ;;  %v147_v20 = vmov 1  }
   0xe   :  { %v26_v2 = vadd.f32 %v25_v1, %v24_v0  ;;  %95 = vset.pattern.permute.xlu1 %v146_v10  ;;  %96 = vset.pattern.permute.xlu0 %v147_v20  ;;  %v51_v24 = vld [vmem:[%s175_s1] sm:$0xff]  ;;  %s148_s15 = smov 1   ;;  %s149_s16 = smov [#allocation5]  }
   0xf   :  { %s81_s17 = sshll.u32 %s149_s16, 4  ;;  %s82_s17 = int_to_ptr.vmem [resolvable:$true] %s81_s17 }
  0x10   :  { %27 = vadd.xlane.f32.xlu0 %v26_v2  ;;  %s121_s1 = scalar_lea.vmem %s82_s17, 256  ;;  %p126_p6 = scmp.lt.s32.totalorder %s82_s17, %s82_s17 }
  0x11   :  { %p122_p5 = scmp.ne.s32.totalorder %s82_s17, %s121_s1  ;;  %p127_p7 = scmp.lt.s32.totalorder %s121_s1, %s121_s1 }
  0x13   :  { %p128_p8 = por %p127_p7, %p126_p6 }
  0x15   :  { %p129_p9 = pnand %p128_p8, %p122_p5 }
  0x99   :  { %v28_v3 = vpop.xlane.xlu0 %27 }
  0x9a   :  { %v29_v4 = vmul.f32 0.00390625, %v28_v3 }
  0x9c   :  { %v30_v5 = vsub.f32 %v24_v0, %v29_v4  ;;  %v31_v6 = vsub.f32 %v25_v1, %v29_v4 }
  0x9e   :  { %v32_v7 = vmul.f32 %v30_v5, %v30_v5  ;;  %v33_v8 = vmul.f32 %v31_v6, %v31_v6 }
  0xa0   :  { %v34_v9 = vadd.f32 %v33_v8, %v32_v7 }
  0xa2   :  { %35 = vadd.xlane.f32.xlu0 %v34_v9 }
 0x12b   :  { %v36_v11 = vpop.xlane.xlu0 %35 }
 0x12c   :  { %v37_v12 = vmul.f32 0.003921569, %v36_v11 }
 0x12e   :  { %v38_v13 = vadd.f32 1e-08, %v37_v12 }
 0x130   :  { %97 = vrsqrt.f32 %v38_v13  ;;  %vm41_vm0 = vcmp.eq.f32.partialorder %v38_v13, inf  ;;  %v44_v16 = vand.u32 2147483648, %v38_v13  ;;  %vm43_vm1 = vcmp.eq.f32.partialorder %v38_v13, 0.0 }
 0x13d   :  { %v98_v14 = vpop.eup %97 }
 0x13e   :  { %v40_v15 = vmul.f32 %v98_v14, %v38_v13 }
 0x140   :  { %v42_v17 = vsel %vm41_vm0, %v38_v13, %v40_v15 }
 0x141   :  { %v45_v18 = vsel %vm43_vm1, %v44_v16, %v42_v17 }
 0x142   :  { %v46_v19 = vadd.f32 1e-05, %v45_v18 }
 0x144   :  { %99 = vrcp.f32 %v46_v19 }
 0x151   :  { %v100_v21 = vpop.eup %99 }
 0x152   :  { %v48_v22 = vmul.f32 %v100_v21, %v46_v19 }
 0x154   :  { %v49_v23 = vsub.f32 2.0, %v48_v22 }
 0x156   :  { %v50_v25 = vmul.f32 %v100_v21, %v49_v23 }
 0x158   :  { %v52_v26 = vmul.f32 %v51_v24, %v50_v25 }
 0x15a   :  { %v53_v27 = vmul.f32 %v52_v26, %v29_v4 }
 0x15c   :  { %55 = vrot.lane.b32.xlu1 %v53_v27, %s148_s15 }
 0x160   :  { %61 = vperm.xlu1 %95, %v52_v26  }
 0x1ce   :  { %v56_v28 = vpop.permute.xlu1 %55 }
 0x1cf   :  { %v58_v29 = vsub.f32 %v51_v24, %v56_v28 }
 0x1d1   :  { %68 = vperm.xlu0 %96, %v58_v29  }
 0x1db   :  { %v62_v30 = vpop.permute.xlu1 %61 }
 0x1dc   :  { %v64_v31 = vmul.f32 %v62_v30, %v24_v0  ;;  %v65_v32 = vmul.f32 %v62_v30, %v25_v1 }
 0x24c   :  { %v69_v33 = vpop.permute.xlu0 %68 }
 0x24d   :  { %v71_v34 = vadd.f32 %v69_v33, %v64_v31  ;;  %v72_v35 = vadd.f32 %v69_v33, %v65_v32 }
 0x24f   :  { %73 = vst [vmem:[#allocation5] sm:$0xff] %v71_v34  ;;  %74 = vst [vmem:[#allocation5 + $0x8] sm:$0xff] %v72_v35 }
 0x250   :  { %132 = shalt.err (!%p129_p9)
}
 0x251   :  { %84 = dma.vmem_to_hbm [thread:$0]  %s82_s17, 256, %s176_s2, [#allocation4]  }
 0x252   :  { %143 = dma.done.wait [#allocation4], 256  }
 0x253   :  { %144 = vsyncadd [#allocation4], 4294967040 }
 0x254   :  { %88 = vsyncpa [#allocation3], 1 }
 0x255   :  { %89 = vsyncpa [#allocation4], 1 }

</bundles_post_ra>
